<compile_context>
chip_gen: v7x
topology: tpu7x:2x2x1
jax: 0.10.0
libtpu: 0.0.40
codegen_flags: <defaults>
</compile_context>

<pallas_src>
import functools

import jax
import jax.numpy as jnp
from jax import lax
from jax.experimental import pallas as pl
from jax.experimental.pallas import tpu as pltpu


# ----------------------------------------------------------------------------
# helpers
# ----------------------------------------------------------------------------
def _round_up(x, m):
    return (x + m - 1) // m * m


def _padded_rows(n, tile):
    """Pad a node count so the row axis tiles cleanly with tile size `tile`."""
    base = _round_up(max(n, 8), 128)
    if base <= tile:
        return base
    return _round_up(base, tile)


def _vmem_budget_bytes():
    """Generation-aware usable VMEM: physical capacity minus ~25% headroom."""
    cap = 64 * 1024 * 1024  # conservative fallback == v7x per-core VMEM
    try:
        info = pltpu.get_tpu_info()
        cap = int(getattr(info, "vmem_capacity_bytes", cap))
    except Exception:
        pass
    return (cap * 3) // 4   # ~48 MiB on v7x, ~96 MiB on v5e/v6e


# ----------------------------------------------------------------------------
# Kernel 1a: fused small-graph propagation
#   all n_layers, all G graphs, embeddings + running sums VMEM-resident
# ----------------------------------------------------------------------------
def _fused_prop_kernel(r_ref, rt_ref, em_ref, ea_ref, out_m_ref, out_a_ref, *,
                       n_layers):
    r = r_ref[...]                         # (nm_p, na_p) bf16
    rt = rt_ref[...]                       # (na_p, nm_p) bf16
    em = em_ref[...]                       # (nm_p, D)  f32
    ea = ea_ref[...]                       # (na_p, D)  f32
    sum_m, sum_a = em, ea                  # layer-0 term
    for _ in range(n_layers):
        new_m = jnp.dot(r, ea.astype(jnp.bfloat16),
                        preferred_element_type=jnp.float32)
        new_a = jnp.dot(rt, em.astype(jnp.bfloat16),
                        preferred_element_type=jnp.float32)
        em, ea = new_m, new_a
        sum_m = sum_m + em
        sum_a = sum_a + ea
    inv = 1.0 / float(n_layers + 1)
    out_m_ref[...] = sum_m * inv
    out_a_ref[...] = sum_a * inv


def _propagate_fused(R_stack, emb_m, emb_a, n_layers, nm_p, na_p, budget):
    G, n_m, n_a = R_stack.shape
    D = emb_m.shape[1]
    Rp = jnp.pad(R_stack, ((0, 0), (0, nm_p - n_m), (0, na_p - n_a)))
    Rp = Rp.astype(jnp.bfloat16)
    RTp = jnp.swapaxes(Rp, 1, 2)
    em = jnp.pad(emb_m, ((0, nm_p - n_m), (0, 0))).astype(jnp.float32)
    ea = jnp.pad(emb_a, ((0, na_p - n_a), (0, 0))).astype(jnp.float32)

    needed = (2 * 2 * nm_p * na_p * 2                       # R / RT, dbl-buf bf16
              + 4 * (nm_p * D * 4 + na_p * D * 4)           # emb in + out blocks
              + 6 * (nm_p * D * 4 + na_p * D * 4))          # live f32 intermediates
    vmem_limit = int(min(max(needed, 32 * 1024 * 1024), budget))

    mean_m, mean_a = pl.pallas_call(
        functools.partial(_fused_prop_kernel, n_layers=n_layers),
        out_shape=(jax.ShapeDtypeStruct((G, nm_p, D), jnp.float32),
                   jax.ShapeDtypeStruct((G, na_p, D), jnp.float32)),
        grid_spec=pltpu.PrefetchScalarGridSpec(
            num_scalar_prefetch=0,
            grid=(G,),
            in_specs=[
                pl.BlockSpec((None, nm_p, na_p), lambda g: (g, 0, 0)),
                pl.BlockSpec((None, na_p, nm_p), lambda g: (g, 0, 0)),
                # 2-D shared embeddings: index_map ignores g (single fetch,
                # no (G, N, D) broadcast ever materialized in HBM)
                pl.BlockSpec((nm_p, D), lambda g: (0, 0)),
                pl.BlockSpec((na_p, D), lambda g: (0, 0)),
            ],
            out_specs=(pl.BlockSpec((None, nm_p, D), lambda g: (g, 0, 0)),
                       pl.BlockSpec((None, na_p, D), lambda g: (g, 0, 0))),
        ),
        compiler_params=pltpu.CompilerParams(
            dimension_semantics=("parallel",),
            vmem_limit_bytes=vmem_limit),
    )(Rp, RTp, em, ea)
    return mean_m[:, :n_m, :], mean_a[:, :n_a, :]


# ----------------------------------------------------------------------------
# Kernel 1b: tiled batched matmul with K-split accumulator (large graphs)
#   (G, M, K) @ (K, D | G, K, D) -> (G, M, D) f32
# ----------------------------------------------------------------------------
def _bmm_kernel(a_ref, b_ref, o_ref, acc_ref):
    @pl.when(pl.program_id(2) == 0)
    def _():
        acc_ref[...] = jnp.zeros_like(acc_ref)

    acc_ref[...] += jnp.dot(a_ref[...], b_ref[...],
                            preferred_element_type=jnp.float32)

    @pl.when(pl.program_id(2) == pl.num_programs(2) - 1)
    def _():
        o_ref[...] = acc_ref[...]


def bmm_padded(a, b, *, tm, budget):
    """bf16 MXU matmul with f32 K-split accumulation (2-D b shared across G)."""
    a = a.astype(jnp.bfloat16)
    b = b.astype(jnp.bfloat16)
    G, M, K = a.shape
    b_shared = (b.ndim == 2)
    D = b.shape[-1]
    assert b.shape[-2] == K
    if not b_shared:
        assert b.shape[0] == G
    assert M % 8 == 0 and K % 128 == 0

    tm_eff = min(tm, M)
    assert M % tm_eff == 0, (M, tm_eff)

    tk_cands = [c for c in (4096, 2048, 1024, 512, 256, 128)
                if c <= K and K % c == 0] or [K]

    def footprint(tm_e, tk_e):
        return (2 * tm_e * tk_e * 2        # A stripe, bf16, double-buffered
                + 2 * tk_e * D * 2         # B stripe, bf16, double-buffered
                + 2 * tm_e * D * 4         # f32 output tile, double-buffered
                + tm_e * D * 4)            # f32 accumulator scratch

    idx = 0
    while footprint(tm_eff, tk_cands[idx]) > budget and idx + 1 < len(tk_cands):
        idx += 1
    tk = tk_cands[idx]
    # TODO(synk): fp8 (v7x) / int8 (v5e,v6e) per-row-scaled adjacency would
    # halve the dominant HBM stream here; not implemented yet.
    vmem_limit = int(min(max(3 * footprint(tm_eff, tk) // 2,
                             32 * 1024 * 1024), budget))

    if b_shared:
        b_spec = pl.BlockSpec((tk, D), lambda g, i, k: (k, 0))
    else:
        b_spec = pl.BlockSpec((None, tk, D), lambda g, i, k: (g, k, 0))

    return pl.pallas_call(
        _bmm_kernel,
        out_shape=jax.ShapeDtypeStruct((G, M, D), jnp.float32),
        grid_spec=pltpu.PrefetchScalarGridSpec(
            num_scalar_prefetch=0,
            grid=(G, M // tm_eff, K // tk),
            in_specs=[
                pl.BlockSpec((None, tm_eff, tk), lambda g, i, k: (g, i, k)),
                b_spec,
            ],
            out_specs=pl.BlockSpec((None, tm_eff, D), lambda g, i, k: (g, i, 0)),
            scratch_shapes=[pltpu.VMEM((tm_eff, D), jnp.float32)],
        ),
        compiler_params=pltpu.CompilerParams(
            dimension_semantics=("parallel", "parallel", "arbitrary"),
            vmem_limit_bytes=vmem_limit),
    )(a, b)


def _propagate_tiled(R_stack, emb_m, emb_a, n_layers, tm, budget):
    G, n_m, n_a = R_stack.shape
    D = emb_m.shape[1]
    nm_p = _padded_rows(n_m, tm)
    na_p = _padded_rows(n_a, tm)
    Rp = jnp.pad(R_stack, ((0, 0), (0, nm_p - n_m), (0, na_p - n_a)))
    Rp = Rp.astype(jnp.bfloat16)
    RTp = jnp.swapaxes(Rp, 1, 2)
    em0 = jnp.pad(emb_m, ((0, nm_p - n_m), (0, 0))).astype(jnp.float32)
    ea0 = jnp.pad(emb_a, ((0, na_p - n_a), (0, 0))).astype(jnp.float32)

    em, ea = em0, ea0                 # 2-D for layer 1 (shared across graphs)
    sum_m = None
    sum_a = None
    for _ in range(n_layers):
        new_m = bmm_padded(Rp, ea, tm=tm, budget=budget)    # (G, nm_p, D)
        new_a = bmm_padded(RTp, em, tm=tm, budget=budget)   # (G, na_p, D)
        em, ea = new_m, new_a
        sum_m = new_m if sum_m is None else sum_m + new_m
        sum_a = new_a if sum_a is None else sum_a + new_a
    # TODO(synk): fuse this running sum + bf16 recast into the bmm kernel via
    # input_output_aliases to drop one f32 (G,N,D) HBM round trip per layer.
    inv = 1.0 / float(n_layers + 1)
    if sum_m is None:
        mean_m = jnp.broadcast_to(em0[None], (G, nm_p, D))
        mean_a = jnp.broadcast_to(ea0[None], (G, na_p, D))
    else:
        mean_m = (sum_m + em0[None, :, :]) * inv
        mean_a = (sum_a + ea0[None, :, :]) * inv
    return mean_m[:, :n_m, :], mean_a[:, :n_a, :]


def forward_gcn_batched(R_stack, emb_m, emb_a, n_layers):
    """LightGCN propagation for G stacked graphs; layer mean returned."""
    G, n_m, n_a = R_stack.shape
    D = emb_m.shape[1]
    budget = _vmem_budget_bytes()

    nm_f = _round_up(max(n_m, 8), 128)
    na_f = _round_up(max(n_a, 8), 128)
    fused_bytes = (2 * 2 * nm_f * na_f * 2
                   + 4 * (nm_f * D * 4 + na_f * D * 4)
                   + 6 * (nm_f * D * 4 + na_f * D * 4))
    if fused_bytes <= budget // 2:
        return _propagate_fused(R_stack, emb_m, emb_a, n_layers, nm_f, na_f,
                                budget)
    tm = 1024 if budget >= 80 * 1024 * 1024 else 512
    return _propagate_tiled(R_stack, emb_m, emb_a, n_layers, tm, budget)


# ----------------------------------------------------------------------------
# Kernel 2: fused BPR loss + reg loss
# ----------------------------------------------------------------------------
def _bpr_reg_kernel(m_ref, p_ref, n_ref, loss_ref, reg_ref):
    m = m_ref[...]
    p = p_ref[...]
    n = n_ref[...]
    pos_r = jnp.sum(m * p, axis=-1, keepdims=True)        # (B, 1)
    neg_r = jnp.sum(m * n, axis=-1, keepdims=True)        # (B, 1)
    x = neg_r - pos_r
    sp = jnp.maximum(x, 0.0) + jnp.log(1.0 + jnp.exp(-jnp.abs(x)))  # softplus
    inv_b = 1.0 / float(m.shape[0])
    loss_ref[0, 0] = jnp.sum(sp) * inv_b
    reg_ref[0, 0] = 0.5 * (jnp.sum(m * m) + jnp.sum(p * p) + jnp.sum(n * n)) * inv_b


def bpr_reg_loss(m_emb, pos_emb, neg_emb):
    # TODO(synk): tile over the batch with an SMEM accumulator (and fuse the
    # embedding gather via scalar prefetch) for training-scale batches.
    loss, reg = pl.pallas_call(
        _bpr_reg_kernel,
        out_shape=(jax.ShapeDtypeStruct((1, 1), jnp.float32),
                   jax.ShapeDtypeStruct((1, 1), jnp.float32)),
        out_specs=(pl.BlockSpec(memory_space=pltpu.MemorySpace.SMEM),
                   pl.BlockSpec(memory_space=pltpu.MemorySpace.SMEM)),
    )(m_emb, pos_emb, neg_emb)
    return loss[0, 0], reg[0, 0]


# ----------------------------------------------------------------------------
# Kernel 3: SSL (InfoNCE) loss, row-tiled logsumexp, SMEM scalar reduction
# ----------------------------------------------------------------------------
def _ssl_kernel(e1_ref, e2t_ref, out_ref, *, inv_temp, n_valid):
    i = pl.program_id(0)

    @pl.when(i == 0)
    def _():
        out_ref[0, 0] = jnp.float32(0.0)

    tq = e1_ref.shape[0]
    mp = e2t_ref.shape[1]
    e1 = e1_ref[...]                                               # (tq, D) bf16
    scores = jnp.dot(e1, e2t_ref[...],
                     preferred_element_type=jnp.float32) * inv_temp  # (tq, mp)
    col = lax.broadcasted_iota(jnp.int32, (tq, mp), 1)
    row = lax.broadcasted_iota(jnp.int32, (tq, mp), 0) + i * tq
    scores = jnp.where(col < n_valid, scores, jnp.float32(-1e30))  # mask pad cols
    pos = jnp.sum(jnp.where(col == row, scores, 0.0), axis=-1, keepdims=True)
    mx = jnp.max(scores, axis=-1, keepdims=True)
    lse = mx + jnp.log(jnp.sum(jnp.exp(scores - mx), axis=-1, keepdims=True))
    row_ids = lax.broadcasted_iota(jnp.int32, (tq, 1), 0) + i * tq
    contrib = jnp.where(row_ids < n_valid, lse - pos, 0.0)         # mask pad rows
    out_ref[0, 0] += jnp.sum(contrib)


def ssl_loss(e1, e2, temp):
    M, D = e1.shape
    mp = _round_up(max(M, 8), 128)
    tq = mp
    for cand in (1024, 512, 256, 128):
        if cand <= mp and mp % cand == 0:
            tq = cand
            break
    e1p = jnp.pad(e1, ((0, mp - M), (0, 0))).astype(jnp.bfloat16)
    e2p = jnp.pad(e2, ((0, mp - M), (0, 0))).astype(jnp.bfloat16)
    e2t = jnp.transpose(e2p)           # one-time (D, M) transpose in the wrapper

    total = pl.pallas_call(
        functools.partial(_ssl_kernel, inv_temp=1.0 / float(temp), n_valid=M),
        out_shape=jax.ShapeDtypeStruct((1, 1), jnp.float32),
        grid_spec=pltpu.PrefetchScalarGridSpec(
            num_scalar_prefetch=0,
            grid=(mp // tq,),
            in_specs=[
                pl.BlockSpec((tq, D), lambda i: (i, 0)),    # e1 row tile
                pl.BlockSpec((D, mp), lambda i: (0, 0)),    # e2^T resident
            ],
            out_specs=pl.BlockSpec(memory_space=pltpu.MemorySpace.SMEM),
        ),
        compiler_params=pltpu.CompilerParams(
            dimension_semantics=("arbitrary",)),
    )(e1p, e2t)
    # TODO(synk): flash-style column streaming (online logsumexp) once the
    # unique-node count pressures VMEM (v7x's 64 MiB first).
    return total[0, 0] / float(M)


# ----------------------------------------------------------------------------
# Plain-JAX glue mirroring the PyTorch module
# ----------------------------------------------------------------------------
def xavier_uniform(key, shape):
    fan_out, fan_in = shape  # torch convention for Embedding weights
    a = jnp.sqrt(6.0 / (fan_in + fan_out))
    return jax.random.uniform(key, shape, jnp.float32, minval=-a, maxval=a)


def l2_normalize(x, eps=1e-12):
    # mirrors F.normalize(x, p=2, dim=1)
    n = jnp.sqrt(jnp.sum(x * x, axis=1, keepdims=True))
    return x / jnp.maximum(n, eps)


def build_norm_bipartite(R):
    """Normalized bipartite block  D_m^{-1/2} R D_a^{-1/2}  of the adjacency."""
    dm = jnp.sum(R, axis=1)
    da = jnp.sum(R, axis=0)
    dmi = jnp.where(dm > 0, 1.0 / jnp.sqrt(jnp.maximum(dm, 1e-12)), 0.0)
    dai = jnp.where(da > 0, 1.0 / jnp.sqrt(jnp.maximum(da, 1e-12)), 0.0)
    return R * dmi[:, None] * dai[None, :]


def lightgcn_forward(params, R_norm, R1_norm, R2_norm,
                     mashups, pos_apis, neg_apis,
                     *, n_mashups, n_apis, n_layers, ssl_temp):
    emb_m, emb_a = params["emb_mashup"], params["emb_api"]

    # TODO(synk): dataset.getDiffSparseGraph is dataset-specific diffusion on
    # the augmented graphs; the augmented (normalized) graphs are used directly.
    R_stack = jnp.stack([R_norm, R1_norm, R2_norm], axis=0)
    mean_m, mean_a = forward_gcn_batched(R_stack, emb_m, emb_a, n_layers)

    m_embs, a_embs = mean_m[0], mean_a[0]
    m_embs1, a_embs1 = mean_m[1], mean_a[1]
    m_embs2, a_embs2 = mean_m[2], mean_a[2]

    m_e, p_e, n_e = m_embs[mashups], a_embs[pos_apis], a_embs[neg_apis]
    # loss1/loss2/reg_loss1/reg_loss2 of the reference are never returned; elided.
    loss, reg_loss = bpr_reg_loss(m_e, p_e, n_e)

    m_embs1_n, a_embs1_n = l2_normalize(m_embs1), l2_normalize(a_embs1)
    m_embs2_n, a_embs2_n = l2_normalize(m_embs2), l2_normalize(a_embs2)

    # TODO(synk): torch.unique has a data-dependent output shape; indices are
    # constructed unique here, so sorting reproduces unique()'s behavior.
    idx_m = jnp.sort(mashups)
    idx_a = jnp.sort(pos_apis)
    ssl_mashups = ssl_loss(m_embs1_n[idx_m], m_embs2_n[idx_m], ssl_temp)
    ssl_apis = ssl_loss(a_embs1_n[idx_a], a_embs2_n[idx_a], ssl_temp)

    return loss, reg_loss, ssl_mashups, ssl_apis


if __name__ == "__main__":
    # small synthetic config (args.recdim=128, args.layer=2, args.ssl_temp=0.2)
    n_mashups, n_apis, latent_dim, n_layers, ssl_temp = 48, 80, 128, 2, 0.2
    batch = 16

    key = jax.random.PRNGKey(0)
    ks = jax.random.split(key, 10)

    params = {
        "emb_mashup": xavier_uniform(ks[0], (n_mashups, latent_dim)),
        "emb_api": xavier_uniform(ks[1], (n_apis, latent_dim)),
        # defined (and unused in forward) exactly as in the reference module
        "emb_mashup_mashup": xavier_uniform(ks[2], (n_mashups, latent_dim)),
        "emb_api_api": xavier_uniform(ks[3], (n_apis, latent_dim)),
    }

    # deterministic synthetic interaction matrix + edge-dropped augmentations
    R = (jax.random.uniform(ks[4], (n_mashups, n_apis)) < 0.15).astype(jnp.float32)
    drop1 = (jax.random.uniform(ks[5], R.shape) < 0.9).astype(jnp.float32)
    drop2 = (jax.random.uniform(ks[6], R.shape) < 0.9).astype(jnp.float32)
    R_norm = build_norm_bipartite(R)
    R1_norm = build_norm_bipartite(R * drop1)
    R2_norm = build_norm_bipartite(R * drop2)

    # unique mashup / positive-api indices (so torch.unique() semantics hold)
    mashups = jax.random.permutation(ks[7], n_mashups)[:batch].astype(jnp.int32)
    pos_apis = jax.random.permutation(ks[8], n_apis)[:batch].astype(jnp.int32)
    neg_apis = jax.random.randint(ks[9], (batch,), 0, n_apis, jnp.int32)

    # Quick validation of the tiled K-split matmul kernel (the demo's
    # propagation takes the fused path; exercise the large-graph path too).
    ka, kb = jax.random.split(jax.random.PRNGKey(1))
    a_t = jax.random.normal(ka, (3, 128, 256), jnp.float32) * 0.1
    b_t = jax.random.normal(kb, (3, 256, 128), jnp.float32) * 0.1
    out_t = bmm_padded(a_t, b_t, tm=512, budget=_vmem_budget_bytes())
    ref_t = jnp.einsum("gmk,gkd->gmd", a_t, b_t)
    assert bool(jnp.allclose(out_t, ref_t, atol=5e-2, rtol=0)), "bmm mismatch"

    fwd = jax.jit(lightgcn_forward,
                  static_argnames=("n_mashups", "n_apis", "n_layers", "ssl_temp"))
    loss, reg_loss, ssl_m, ssl_a = fwd(
        params, R_norm, R1_norm, R2_norm, mashups, pos_apis, neg_apis,
        n_mashups=n_mashups, n_apis=n_apis, n_layers=n_layers, ssl_temp=ssl_temp)

    jax.block_until_ready((loss, reg_loss, ssl_m, ssl_a))
    print("KERNEL_OK")
</pallas_src>

<mosaic_0001>
module attributes {stable_mosaic.version = 11 : i64} {
  func.func @_bmm_kernel(%arg0: i32, %arg1: i32, %arg2: i32, %arg3: memref<1x128x256xbf16, #tpu.memory_space<vmem>>, %arg4: memref<1x256x128xbf16, #tpu.memory_space<vmem>>, %arg5: memref<1x128x128xf32, #tpu.memory_space<vmem>>, %arg6: memref<128x128xf32, #tpu.memory_space<vmem>>) attributes {dimension_semantics = [#tpu.dimension_semantics<parallel>, #tpu.dimension_semantics<parallel>, #tpu.dimension_semantics<arbitrary>], iteration_bounds = array<i64: 3, 1, 1>, scalar_prefetch = 0 : i64, scratch_operands = 1 : i64, tpu.core_type = #tpu.core_type<tc>, window_params = [{transform_indices = @transform_0, window_bounds = array<i64: 1, 128, 256>}, {transform_indices = @transform_1, window_bounds = array<i64: 1, 256, 128>}, {transform_indices = @transform_2, window_bounds = array<i64: 1, 128, 128>}]} {
    %c0_i32 = arith.constant 0 : i32
    %0 = arith.cmpi eq, %arg2, %c0_i32 : i32
    %1 = arith.extui %0 : i1 to i32
    %c0_i32_0 = arith.constant 0 : i32
    %2 = arith.cmpi ne, %1, %c0_i32_0 : i32
    scf.if %2 {
      %cst_12 = arith.constant 0.000000e+00 : f32
      %14 = vector.broadcast %cst_12 : f32 to vector<128x128xf32>
      %c0_13 = arith.constant 0 : index
      %c0_14 = arith.constant 0 : index
      %15 = vector.load %arg6[%c0_13, %c0_14] : memref<128x128xf32, #tpu.memory_space<vmem>>, vector<128x128xf32>
      tpu.vector_store %arg6[%c0_13, %c0_14], %14 {strides = array<i32>} : memref<128x128xf32, #tpu.memory_space<vmem>>, vector<128x128xf32>,
    } else {
    }
    %c0 = arith.constant 0 : index
    %c0_1 = arith.constant 0 : index
    %3 = vector.load %arg6[%c0, %c0_1] : memref<128x128xf32, #tpu.memory_space<vmem>>, vector<128x128xf32>
    %c0_2 = arith.constant 0 : index
    %c0_3 = arith.constant 0 : index
    %c0_4 = arith.constant 0 : index
    %4 = vector.load %arg3[%c0_2, %c0_3, %c0_4] : memref<1x128x256xbf16, #tpu.memory_space<vmem>>, vector<1x128x256xbf16>
    %5 = vector.shape_cast %4 : vector<1x128x256xbf16> to vector<128x256xbf16>
    %c0_5 = arith.constant 0 : index
    %c0_6 = arith.constant 0 : index
    %c0_7 = arith.constant 0 : index
    %6 = vector.load %arg4[%c0_5, %c0_6, %c0_7] : memref<1x256x128xbf16, #tpu.memory_space<vmem>>, vector<1x256x128xbf16>
    %7 = vector.shape_cast %6 : vector<1x256x128xbf16> to vector<256x128xbf16>
    %cst = arith.constant dense<0.000000e+00> : vector<128x128xf32>
    %8 = tpu.matmul %5, %7, %cst {dimension_numbers = #tpu.dot_dimension_numbers<[1], [0], [0], [1], [0, 0, 1, 1], [], []>} : vector<128x256xbf16>, vector<256x128xbf16>, vector<128x128xf32> -> vector<128x128xf32>
    %9 = arith.addf %3, %8 : vector<128x128xf32>
    %c0_8 = arith.constant 0 : index
    %c0_9 = arith.constant 0 : index
    %10 = vector.load %arg6[%c0_8, %c0_9] : memref<128x128xf32, #tpu.memory_space<vmem>>, vector<128x128xf32>
    tpu.vector_store %arg6[%c0_8, %c0_9], %9 {strides = array<i32>} : memref<128x128xf32, #tpu.memory_space<vmem>>, vector<128x128xf32>,
    %c0_i32_10 = arith.constant 0 : i32
    %11 = arith.cmpi eq, %arg2, %c0_i32_10 : i32
    %12 = arith.extui %11 : i1 to i32
    %c0_i32_11 = arith.constant 0 : i32
    %13 = arith.cmpi ne, %12, %c0_i32_11 : i32
    scf.if %13 {
      %c0_12 = arith.constant 0 : index
      %c0_13 = arith.constant 0 : index
      %14 = vector.load %arg6[%c0_12, %c0_13] : memref<128x128xf32, #tpu.memory_space<vmem>>, vector<128x128xf32>
      %c0_14 = arith.constant 0 : index
      %c0_15 = arith.constant 0 : index
      %c0_16 = arith.constant 0 : index
      %15 = vector.load %arg5[%c0_14, %c0_15, %c0_16] : memref<1x128x128xf32, #tpu.memory_space<vmem>>, vector<1x128x128xf32>
      %16 = vector.shape_cast %15 : vector<1x128x128xf32> to vector<128x128xf32>
      %17 = vector.shape_cast %14 : vector<128x128xf32> to vector<1x128x128xf32>
      tpu.vector_store %arg5[%c0_14, %c0_15, %c0_16], %17 {strides = array<i32>} : memref<1x128x128xf32, #tpu.memory_space<vmem>>, vector<1x128x128xf32>,
    } else {
    }
    return
  }
  func.func @transform_0(%arg0: i32, %arg1: i32, %arg2: i32) -> (i32, i32, i32) {
    %c0_i32 = arith.constant 0 : i32
    return %arg0, %arg1, %arg2 : i32, i32, i32
  }
  func.func @transform_1(%arg0: i32, %arg1: i32, %arg2: i32) -> (i32, i32, i32) {
    %c0_i32 = arith.constant 0 : i32
    %c0_i32_0 = arith.constant 0 : i32
    return %arg0, %arg2, %c0_i32 : i32, i32, i32
  }
  func.func @transform_2(%arg0: i32, %arg1: i32, %arg2: i32) -> (i32, i32, i32) {
    %c0_i32 = arith.constant 0 : i32
    %c0_i32_0 = arith.constant 0 : i32
    return %arg0, %arg1, %c0_i32 : i32, i32, i32
  }
}

</mosaic_0001>

<bundles_post_ra>
// kernel: tpu_custom_call.1
= control target key start
LH: loop header
LB: loop body
LE: loop exit
PB: predicated region body
PF: predicated region fallthrough
CT: control target
= control target key end

     0   :  { %7 = vsyncpa [#allocation4], 0  ;;  %s1506_s0 = inlined_call_operand.hbm [shape: bf16[3,128,256], index: 0, kind: input, shape index: {}]   ;;  %s1507_s1 = inlined_call_operand.hbm [shape: bf16[3,256,128], index: 1, kind: input, shape index: {}]   ;;  %s1508_s2 = inlined_call_operand.hbm [shape: f32[3,128,128], index: 2, kind: output, shape index: {}]  }
   0x1   :  { %9 = vsyncpa [#allocation4 + $0x1], 0 }
   0x2   :  { %10 = vsyncpa [#allocation7], 0 }
   0x3   :  { %12 = vsyncpa [#allocation7 + $0x1], 0 }
   0x4   :  { %13 = vsyncpa [#allocation5], 0 }
   0x5   :  { %15 = vsyncpa [#allocation5 + $0x1], 0  ;;  %s1218_s9 = smov 0   ;;  %s1220_s10 = smov 0  }
   0x6   :  { %s1222_s11 = smov 0   ;;  %s1224_s12 = smov 0  }
   0x7   :  { %s1226_s13 = smov 0   ;;  %s1228_s14 = smov 0  }
   0x8 LB: > { %s799_s15 = sadd.s32 4294967295, %s1192_s14   ;;  %s800_s16 = sadd.s32 4294967294, %s1192_s14   ;;  %s1192_s14 = sphi %s1228_s14, %s21_s14   ;;  %s1188_s13 = sphi %s1226_s13, %s1525_s13   ;;  %s1184_s12 = sphi %s1224_s12, %s1524_s12   ;;  %s1180_s11 = sphi %s1222_s11, %s1523_s11   ;;  %s1176_s10 = sphi %s1220_s10, %s1522_s10   ;;  %s1172_s9 = sphi %s1218_s9, %s1521_s9  }
   0x9   : > { %s40_s17 = sadd.s32 1, %s1188_s13  ;;  %s51_s18 = sadd.s32 1, %s1180_s11 }
   0xa   : > { %p42_p0 = scmp.ge.s32.totalorder %s40_s17, 3  ;;  %p58_p1 = scmp.ne.s32.totalorder %s1180_s11, %s1176_s10 }
   0xb   : > { %p59_p2 = scmp.eq.s32.totalorder %s1192_s14, 0  ;;  %p64_p3 = scmp.ne.s32.totalorder %s1176_s10, %s1172_s9 }
   0xc   : > { %s1527_s17 = smov (%p42_p0, %s40_s17), 0  ;;  %p65_p5 = scmp.eq.s32.totalorder %s799_s15, 0 }
   0xd   : > { %p1259_p4 = por %p59_p2, %p58_p1  ;;  %s44_s20 = ssub.s32 %s1188_s13, %s1527_s17 }
   0xe   : > { %p118_p6 = scmp.eq.s32.totalorder %s799_s15, 2  ;;  %p49_p7 = scmp.eq.s32.totalorder %s44_s20, 0 }
   0xf   : > { %p1265_p8 = por %p65_p5, %p64_p3  ;;  %p124_p10 = scmp.eq.s32.totalorder %s800_s16, 2 }
  0x10   : > { %p1269_p9 = por %p118_p6, %p58_p1  ;;  %p950_p12 = scmp.lt.s32.totalorder %s1192_s14, 3 }
  0x11   : > { %s1512_s21 = scalar_select %p1265_p8, 1, 0 }
  0x12   : > { %s1513_s22 = scalar_select %p1269_p9, 1, 0 }
  0x13   : > { %s1274_s23 = scalar_select %p49_p7, %s1180_s11, %s51_s18  }
  0x14   : > { %p1276_p11 = por %p124_p10, %p64_p3  ;;  %s1282_s25 = sand.u32 1, %s1180_s11  }
  0x15   : > { %s803_s26 = sshll.u32 %s1282_s25, 7  ;;  %s850_s27 = sshll.u32 %s1188_s13, 11 }
  0x16   : > { %s1514_s24 = scalar_select %p1276_p11, 1, 0 }
  0x17   : > { %s1291_s30 = scalar_lea.hbm %s1506_s0, %s850_s27  ;;  %s148_s3 = scalar_lea.vmem [#allocation3], %s803_s26 }
  0x18   : > { %s160_s4 = sshll.u32 %s148_s3, 4  ;;  %p1299_p13 = pnand %p950_p12, %p1259_p4  ;;  %s1295_s4 = int_to_ptr.vmem [resolvable:$true] %s160_s4 }
  0x19   : > { %s145_s6 = scalar_lea.sflag [#allocation4], %s1282_s25  ;;  %s1046_s7 = scalar_lea.hbm %s1291_s30, 2048 }
  0x1a   : > { %p1047_p1 = scmp.ne.s32.totalorder %s1291_s30, %s1046_s7  ;;  %p1048_p2 = pneg %p1299_p13 }
  0x1b   : > { %s1051_s16 = scalar_lea.hbm %s1506_s0, 6144  ;;  %p1052_p4 = scmp.lt.u32.totalorder %s1291_s30, %s1506_s0 }
  0x1c   : > { %p1049_p3 = pnand %p1048_p2, %p1047_p1  ;;  %p1053_p6 = scmp.lt.u32.totalorder %s1051_s16, %s1046_s7 }
  0x1d   : > { %p1055_p10 = scmp.lt.u32.totalorder %s1046_s7, %s1291_s30 }
  0x1e   : > { %p1050_p5 = pneg %p1049_p3  ;;  %p1054_p7 = por %p1053_p6, %p1052_p4 }
  0x20   : > { %p1056_p12 = por %p1055_p10, %p1054_p7 }
  0x22   : > { %p1057_p0 = pnand %p1056_p12, %p1050_p5 }
  0x24   : > { %1060 = shalt.err (!%p1057_p0)
}
  0x25   : > { %s1061_s20 = scalar_lea.vmem %s1295_s4, 2048  ;;  %s1194_s28 = smov [#allocation3]  }
  0x26   : > { %p1062_p1 = scmp.ne.s32.totalorder %s1295_s4, %s1061_s20  ;;  %s1066_s29 = sshll.u32 %s1194_s28, 4  ;;  %s1067_s29 = int_to_ptr.vmem [resolvable:$false] %s1066_s29 }
  0x27   : > { %s1068_s3 = scalar_lea.vmem %s1067_s29, 4096  ;;  %p1069_p9 = scmp.lt.s32.totalorder %s1295_s4, %s1067_s29 }
  0x28   : > { %p1064_p3 = pnand %p1062_p1, %p1048_p2  ;;  %p1070_p4 = scmp.lt.s32.totalorder %s1068_s3, %s1061_s20 }
  0x2a   : > { %p1065_p11 = pneg %p1064_p3  ;;  %p1071_p6 = por %p1070_p4, %p1069_p9 }
  0x2c   : > { %p1072_p7 = pnand %p1071_p6, %p1065_p11 }
  0x2e   : > { %1075 = shalt.err (!%p1072_p7)
}
  0x2f   : > { %s1195_s7 = smov 128   ;;  %s1196_s8 = smov 8  }
  0x30   : > { %942 = dma.hbm_to_vmem [thread:$0]  (!%p1299_p13), %s1291_s30, 2048, %s1295_s4, %s145_s6, %s1195_s7, %s1195_s7, %s1196_s8  }
  0x31   : > { %p191_p0 = scmp.lt.s32.totalorder %s1192_s14, 4  ;;  %s1338_s18 = scalar_lea.hbm %s1507_s1, %s850_s27 }
  0x32   : > { %p1516_p9 = scmp.ge.s32.totalorder %s1192_s14, 1  ;;  %s174_s20 = scalar_lea.vmem [#allocation6], %s803_s26 }
  0x33   : > { %s183_s28 = sshll.u32 %s174_s20, 4  ;;  %s171_s30 = scalar_lea.sflag [#allocation7], %s1282_s25  ;;  %s1348_s28 = int_to_ptr.vmem [resolvable:$true] %s183_s28 }
  0x34   : > { %p1342_p11 = pnand %p1516_p9, %p191_p0  ;;  %s1076_s4 = scalar_lea.hbm %s1338_s18, 2048 }
  0x35   : > { %p1077_p5 = scmp.ne.s32.totalorder %s1338_s18, %s1076_s4  ;;  %s1081_s29 = scalar_lea.hbm %s1507_s1, 6144 }
  0x36   : > { %p1082_p1 = scmp.lt.u32.totalorder %s1338_s18, %s1507_s1  ;;  %p1083_p3 = scmp.lt.u32.totalorder %s1081_s29, %s1076_s4 }
  0x37   : > { %p1079_p10 = pnand %p1077_p5, %p1048_p2  ;;  %p1085_p6 = scmp.lt.u32.totalorder %s1076_s4, %s1338_s18 }
  0x38   : > { %p1084_p4 = por %p1083_p3, %p1082_p1 }
  0x39   : > { %p1080_p12 = pneg %p1079_p10 }
  0x3a   : > { %p1086_p7 = por %p1085_p6, %p1084_p4 }
  0x3c   : > { %p1087_p0 = pnand %p1086_p7, %p1080_p12 }
  0x3e   : > { %1090 = shalt.err (!%p1087_p0)
}
  0x3f   : > { %s1091_s26 = scalar_lea.vmem %s1348_s28, 2048  ;;  %s1197_s8 = smov [#allocation6]  }
  0x40   : > { %p1092_p9 = scmp.ne.s32.totalorder %s1348_s28, %s1091_s26  ;;  %s1096_s15 = sshll.u32 %s1197_s8, 4  ;;  %s1097_s15 = int_to_ptr.vmem [resolvable:$false] %s1096_s15 }
  0x41   : > { %s1098_s16 = scalar_lea.vmem %s1097_s15, 4096  ;;  %p1099_p8 = scmp.lt.s32.totalorder %s1348_s28, %s1097_s15 }
  0x42   : > { %p1094_p5 = pnand %p1092_p9, %p1048_p2  ;;  %p1100_p1 = scmp.lt.s32.totalorder %s1098_s16, %s1091_s26 }
  0x44   : > { %p1095_p10 = pneg %p1094_p5  ;;  %p1101_p3 = por %p1100_p1, %p1099_p8 }
  0x46   : > { %p1102_p4 = pnand %p1101_p3, %p1095_p10 }
  0x48   : > { %1105 = shalt.err (!%p1102_p4)
}
  0x49   : > { %s1198_s20 = smov 64   ;;  %s1199_s4 = smov 4  }
  0x4a   : > { %945 = dma.hbm_to_vmem [thread:$0]  (!%p1299_p13), %s1338_s18, 2048, %s1348_s28, %s171_s30, %s1198_s20, %s1198_s20, %s1199_s4  }
  0x4b   : > { %195 = sbr.rel (%p1342_p11) target bundleno = 374 (0x176), region = 28  ;;  %s1379_s27 = sand.u32 (!%p1342_p11), 1, %s1176_s10  }
  0x4c   : > { %s1382_s6 = sshll.u32 (!%p1342_p11), %s1379_s27, 7  ;;  %s198_s29 = scalar_lea.sflag (!%p1342_p11), [#allocation4], %s1379_s27 }
  0x4d   : > { %s1386_s3 = scalar_lea.vmem (!%p1342_p11), [#allocation3], %s1382_s6  ;;  %p1518_p8 = scmp.ne.s32.totalorder (!%p1342_p11), %s1512_s21, 0 }
  0x52   : > { %1159 = dma.done.wait (%p1518_p8), %s198_s29, 2048  }
  0x53   : > { %1161 = vsyncadd (%p1518_p8), %s198_s29, 4294965248  ;;  %s207_s25 = scalar_lea.sflag [#allocation7], %s1379_s27  ;;  %s1394_s5 = scalar_lea.vmem [#allocation6], %s1382_s6 }
  0x54   : > { %1163 = dma.done.wait (%p1518_p8), %s207_s25, 2048  }
  0x55   : > { %1165 = vsyncadd (%p1518_p8), %s207_s25, 4294965248  ;;  %v1006_v0 = vld [vmem:[%s1394_s5 + $0x40] sm:$0xff]   ;;  %v1008_v2 = vld [vmem:[%s1394_s5 + $0x48] sm:$0xff]   ;;  %s1433_s21 = scalar_lea.vmem [#allocation8], %s1382_s6  ;;  %s852_s18 = sshll.u32 %s1184_s12, 11 }
  0x56   : > { %v1007_v1 = vld [vmem:[%s1394_s5] sm:$0xff]   ;;  %853 = vmatprep.subr.bf16.mxu0 %v1006_v0  ;;  %917 = vmatprep.subr.bf16.mxu1 %v1006_v0  ;;  %v1009_v3 = vld [vmem:[%s1394_s5 + $0x8] sm:$0xff]   ;;  %v1010_v4 = vld [vmem:[%s1394_s5 + $0x50] sm:$0xff]   ;;  %s681_s19 = sshll.u32 %s1433_s21, 4  ;;  %s1452_s7 = scalar_lea.hbm %s1508_s2, %s852_s18  ;;  %s1454_s19 = int_to_ptr.vmem [resolvable:$true] %s681_s19 }
  0x57   : > { %854 = vmatpush3.bf16.msra.mxu0 %v1007_v1  ;;  %925 = vmatpush3.bf16.msra.mxu1 %v1007_v1  ;;  %v1011_v5 = vld [vmem:[%s1394_s5 + $0x10] sm:$0xff]   ;;  %v1012_v6 = vld [vmem:[%s1394_s5 + $0x58] sm:$0xff]   ;;  %v1014_v8 = vld [vmem:[%s1394_s5 + $0x60] sm:$0xff]   ;;  %s666_s12 = scalar_lea.sflag [#allocation5], %s1379_s27  ;;  %s1106_s26 = scalar_lea.vmem %s1454_s19, 2048 }
  0x58   : > { %855 = vmatprep.subr.bf16.mxu0 %v1008_v2  ;;  %918 = vmatprep.subr.bf16.mxu1 %v1008_v2  ;;  %v1013_v7 = vld [vmem:[%s1394_s5 + $0x18] sm:$0xff]   ;;  %v1015_v9 = vld [vmem:[%s1394_s5 + $0x20] sm:$0xff]   ;;  %v1016_v10 = vld [vmem:[%s1394_s5 + $0x68] sm:$0xff]   ;;  %p1107_p13 = scmp.ne.s32.totalorder %s1454_s19, %s1106_s26  ;;  %p1519_p2 = scmp.ne.s32.totalorder %s1513_s22, 0 }
  0x59   : > { %v1024_v11 = vld [vmem:[%s1386_s3 + $0x4] ss:$8 sps:$4 sm:$0xff]   ;;  %v1018_v14 = vld [vmem:[%s1394_s5 + $0x70] sm:$0xff]   ;;  %v1020_v16 = vld [vmem:[%s1394_s5 + $0x78] sm:$0xff]   ;;  %s1200_s8 = smov [#allocation8]  }
  0x5a   : > { %v1027_v12 = vld [vmem:[%s1386_s3 + $0x44] ss:$8 sps:$4 sm:$0xff]   ;;  %533 = vmatprep.mubr.bf16.mxu0 %v1024_v11  ;;  %v1019_v15 = vld [vmem:[%s1394_s5 + $0x30] sm:$0xff]   ;;  %v1021_v17 = vld [vmem:[%s1394_s5 + $0x38] sm:$0xff]   ;;  %p1108_p11 = pnand %p1107_p13, %p1519_p2  ;;  %s1110_s15 = sshll.u32 %s1200_s8, 4  ;;  %s1111_s15 = int_to_ptr.vmem [resolvable:$false] %s1110_s15 }
  0x5b   : > { %856 = vmatpush3.bf16.msra.mxu0 %v1009_v3  ;;  %926 = vmatpush3.bf16.msra.mxu1 %v1009_v3  ;;  %v1017_v13 = vld [vmem:[%s1394_s5 + $0x28] sm:$0xff]   ;;  %v1028_v20 = vld [vmem:[%s1386_s3 + $0x14] ss:$8 sps:$4 sm:$0xff]   ;;  %v1032_v22 = vld [vmem:[%s1386_s3 + $0x10] ss:$8 sps:$4 sm:$0xff]   ;;  %s1112_s16 = scalar_lea.vmem %s1111_s15, 4096  ;;  %p1113_p6 = scmp.lt.s32.totalorder %s1454_s19, %s1111_s15 }
  0x5c   : > { %857 = vmatprep.subr.bf16.mxu0 %v1010_v4  ;;  %919 = vmatprep.subr.bf16.mxu1 %v1010_v4  ;;  %v1022_v18 = vld [vmem:[%s1386_s3] ss:$8 sps:$4 sm:$0xff]   ;;  %v1030_v21 = vld [vmem:[%s1386_s3 + $0x54] ss:$8 sps:$4 sm:$0xff]   ;;  %v1033_v23 = vld [vmem:[%s1386_s3 + $0x50] ss:$8 sps:$4 sm:$0xff]   ;;  %p1109_p12 = pneg %p1108_p11  ;;  %p1114_p7 = scmp.lt.s32.totalorder %s1112_s16, %s1106_s26 }
  0x5d   : > { %565 = vmatprep.mubr.bf16.mxu1 %v1027_v12  ;;  %v1025_v19 = vld [vmem:[%s1386_s3 + $0x40] ss:$8 sps:$4 sm:$0xff]   ;;  %v1034_v24 = vld [vmem:[%s1386_s3 + $0x24] ss:$8 sps:$4 sm:$0xff]   ;;  %v1040_v28 = vld [vmem:[%s1386_s3 + $0x34] ss:$8 sps:$4 sm:$0xff]  }
  0x5e   : > { %v1036_v25 = vld [vmem:[%s1386_s3 + $0x64] ss:$8 sps:$4 sm:$0xff]   ;;  %v1038_v26 = vld [vmem:[%s1386_s3 + $0x20] ss:$8 sps:$4 sm:$0xff]   ;;  %v1042_v29 = vld [vmem:[%s1386_s3 + $0x74] ss:$8 sps:$4 sm:$0xff]   ;;  %p1115_p0 = por %p1114_p7, %p1113_p6 }
  0x5f   : > { %858 = vmatpush3.bf16.msra.mxu0 %v1011_v5  ;;  %927 = vmatpush3.bf16.msra.mxu1 %v1011_v5  ;;  %v1039_v27 = vld [vmem:[%s1386_s3 + $0x60] ss:$8 sps:$4 sm:$0xff]   ;;  %v1044_v30 = vld [vmem:[%s1386_s3 + $0x30] ss:$8 sps:$4 sm:$0xff]  }
  0x60   : > { %859 = vmatprep.subr.bf16.mxu0 %v1012_v6  ;;  %920 = vmatprep.subr.bf16.mxu1 %v1012_v6  ;;  %v1045_v31 = vld [vmem:[%s1386_s3 + $0x70] ss:$8 sps:$4 sm:$0xff]   ;;  %p1116_p9 = pnand %p1115_p0, %p1109_p12 }
  0x63   : > { %860 = vmatpush3.bf16.msra.mxu0 %v1013_v7  ;;  %928 = vmatpush3.bf16.msra.mxu1 %v1013_v7 }
  0x64   : > { %861 = vmatprep.subr.bf16.mxu0 %v1014_v8  ;;  %921 = vmatprep.subr.bf16.mxu1 %v1014_v8 }
  0x67   : > { %862 = vmatpush3.bf16.msra.mxu0 %v1015_v9  ;;  %929 = vmatpush3.bf16.msra.mxu1 %v1015_v9 }
  0x68   : > { %863 = vmatprep.subr.bf16.mxu0 %v1016_v10  ;;  %922 = vmatprep.subr.bf16.mxu1 %v1016_v10 }
  0x6b   : > { %864 = vmatpush3.bf16.msra.mxu0 %v1017_v13  ;;  %930 = vmatpush3.bf16.msra.mxu1 %v1017_v13 }
  0x6c   : > { %865 = vmatprep.subr.bf16.mxu0 %v1018_v14  ;;  %923 = vmatprep.subr.bf16.mxu1 %v1018_v14 }
  0x6f   : > { %866 = vmatpush3.bf16.msra.mxu0 %v1019_v15  ;;  %931 = vmatpush3.bf16.msra.mxu1 %v1019_v15 }
  0x70   : > { %867 = vmatprep.subr.bf16.mxu0 %v1020_v16  ;;  %924 = vmatprep.subr.bf16.mxu1 %v1020_v16 }
  0x73   : > { %868 = vmatpush3.bf16.msra.mxu0 %v1021_v17  ;;  %932 = vmatpush3.bf16.msra.mxu1 %v1021_v17 }
  0x76   : > { %534 = vmatmul.mubr.bf16.vlgmr.msra.gmra.mrb[0].mxu0 %v1022_v18  ;;  %566 = vmatmul.mubr.bf16.vlgmr.msra.gmra.mrb[0].mxu1 %v1025_v19 }
  0x77   : > { %541 = vmatprep.mubr.bf16.mxu0 %v1028_v20  ;;  %573 = vmatprep.mubr.bf16.mxu1 %v1030_v21 }
  0x7e   : > { %542 = vmatmul.mubr.bf16.gmra.mrb[4].mxu0 %v1032_v22  ;;  %574 = vmatmul.mubr.bf16.gmra.mrb[4].mxu1 %v1033_v23 }
  0x7f   : > { %549 = vmatprep.mubr.bf16.mxu0 %v1034_v24  ;;  %581 = vmatprep.mubr.bf16.mxu1 %v1036_v25 }
  0x86   : > { %550 = vmatmul.mubr.bf16.gmra.mrb[8].mxu0 %v1038_v26  ;;  %582 = vmatmul.mubr.bf16.gmra.mrb[8].mxu1 %v1039_v27 }
  0x87   : > { %557 = vmatprep.mubr.bf16.mxu0 %v1040_v28  ;;  %589 = vmatprep.mubr.bf16.mxu1 %v1042_v29 }
  0x8e   : > { %558 = vmatmul.mubr.bf16.gmra.mrb[12].mxu0 %v1044_v30  ;;  %590 = vmatmul.mubr.bf16.gmra.mrb[12].mxu1 %v1045_v31 }
 0x149   : > { %v869_v32 = vpop.f32.mrb[0].mxu0  ;;  %v893_v33 = vpop.f32.mrb[0].mxu1 }
 0x14a   : > { %v870_v34 = vpop.f32.mrb[1].mxu0  ;;  %v894_v35 = vpop.f32.mrb[1].mxu1 }
 0x14b   : > { %v871_v36 = vadd.f32 %v870_v34, %v869_v32  ;;  %v895_v37 = vadd.f32 %v894_v35, %v893_v33  ;;  %v872_v38 = vpop.f32.mrb[2].mxu0  ;;  %v896_v39 = vpop.f32.mrb[2].mxu1 }
 0x14c   : > { %v873_v40 = vpop.f32.mrb[3].mxu0  ;;  %v897_v41 = vpop.f32.mrb[3].mxu1 }
 0x14d   : > { %649 = vst [vmem:[%s1433_s21] sm:$0xff] %v871_v36  ;;  %657 = vst [vmem:[%s1433_s21 + $0x40] sm:$0xff] %v895_v37  ;;  %v874_v42 = vadd.f32 %v873_v40, %v872_v38  ;;  %v898_v43 = vadd.f32 %v897_v41, %v896_v39 }
 0x14f   : > { %650 = vst [vmem:[%s1433_s21 + $0x8] sm:$0xff] %v874_v42  ;;  %658 = vst [vmem:[%s1433_s21 + $0x48] sm:$0xff] %v898_v43 }
 0x151   : > { %v875_v44 = vpop.f32.mrb[4].mxu0  ;;  %v899_v45 = vpop.f32.mrb[4].mxu1 }
 0x152   : > { %v876_v46 = vpop.f32.mrb[5].mxu0  ;;  %v900_v47 = vpop.f32.mrb[5].mxu1 }
 0x153   : > { %v877_v48 = vadd.f32 %v876_v46, %v875_v44  ;;  %v901_v49 = vadd.f32 %v900_v47, %v899_v45  ;;  %v878_v50 = vpop.f32.mrb[6].mxu0  ;;  %v902_v51 = vpop.f32.mrb[6].mxu1 }
 0x154   : > { %v879_v52 = vpop.f32.mrb[7].mxu0  ;;  %v903_v53 = vpop.f32.mrb[7].mxu1 }
 0x155   : > { %651 = vst [vmem:[%s1433_s21 + $0x10] sm:$0xff] %v877_v48  ;;  %659 = vst [vmem:[%s1433_s21 + $0x50] sm:$0xff] %v901_v49  ;;  %v880_v54 = vadd.f32 %v879_v52, %v878_v50  ;;  %v904_v55 = vadd.f32 %v903_v53, %v902_v51 }
 0x157   : > { %652 = vst [vmem:[%s1433_s21 + $0x18] sm:$0xff] %v880_v54  ;;  %660 = vst [vmem:[%s1433_s21 + $0x58] sm:$0xff] %v904_v55 }
 0x159   : > { %v881_v56 = vpop.f32.mrb[8].mxu0  ;;  %v905_v57 = vpop.f32.mrb[8].mxu1 }
 0x15a   : > { %v882_v58 = vpop.f32.mrb[9].mxu0  ;;  %v906_v59 = vpop.f32.mrb[9].mxu1 }
 0x15b   : > { %v883_v60 = vadd.f32 %v882_v58, %v881_v56  ;;  %v907_v61 = vadd.f32 %v906_v59, %v905_v57  ;;  %v884_v62 = vpop.f32.mrb[10].mxu0  ;;  %v908_v63 = vpop.f32.mrb[10].mxu1 }
 0x15c   : > { %v885_v0 = vpop.f32.mrb[11].mxu0  ;;  %v909_v1 = vpop.f32.mrb[11].mxu1 }
 0x15d   : > { %653 = vst [vmem:[%s1433_s21 + $0x20] sm:$0xff] %v883_v60  ;;  %661 = vst [vmem:[%s1433_s21 + $0x60] sm:$0xff] %v907_v61  ;;  %v886_v2 = vadd.f32 %v885_v0, %v884_v62  ;;  %v910_v3 = vadd.f32 %v909_v1, %v908_v63 }
 0x15f   : > { %654 = vst [vmem:[%s1433_s21 + $0x28] sm:$0xff] %v886_v2  ;;  %662 = vst [vmem:[%s1433_s21 + $0x68] sm:$0xff] %v910_v3 }
 0x161   : > { %v887_v4 = vpop.f32.mrb[12].mxu0  ;;  %v911_v5 = vpop.f32.mrb[12].mxu1 }
 0x162   : > { %v888_v6 = vpop.f32.mrb[13].mxu0  ;;  %v912_v7 = vpop.f32.mrb[13].mxu1 }
 0x163   : > { %v889_v8 = vadd.f32 %v888_v6, %v887_v4  ;;  %v913_v9 = vadd.f32 %v912_v7, %v911_v5  ;;  %v890_v10 = vpop.f32.mrb[14].mxu0  ;;  %v914_v11 = vpop.f32.mrb[14].mxu1 }
 0x164   : > { %v891_v12 = vpop.f32.mrb[15].mxu0  ;;  %v915_v13 = vpop.f32.mrb[15].mxu1 }
 0x165   : > { %655 = vst [vmem:[%s1433_s21 + $0x30] sm:$0xff] %v889_v8  ;;  %663 = vst [vmem:[%s1433_s21 + $0x70] sm:$0xff] %v913_v9  ;;  %v892_v14 = vadd.f32 %v891_v12, %v890_v10  ;;  %v916_v15 = vadd.f32 %v915_v13, %v914_v11 }
 0x167   : > { %656 = vst [vmem:[%s1433_s21 + $0x38] sm:$0xff] %v892_v14  ;;  %664 = vst [vmem:[%s1433_s21 + $0x78] sm:$0xff] %v916_v15 }
 0x168   : > { %1119 = shalt.err (!%p1116_p9)
}
 0x169   : > { %s1120_s20 = scalar_lea.hbm %s1452_s7, 2048  ;;  %s1124_s29 = scalar_lea.hbm %s1508_s2, 6144 }
 0x16a   : > { %p1121_p5 = scmp.ne.s32.totalorder %s1452_s7, %s1120_s20  ;;  %p1125_p3 = scmp.lt.u32.totalorder %s1452_s7, %s1508_s2 }
 0x16b   : > { %p1126_p4 = scmp.lt.u32.totalorder %s1124_s29, %s1120_s20  ;;  %p1128_p13 = scmp.lt.u32.totalorder %s1120_s20, %s1452_s7 }
 0x16c   : > { %p1122_p10 = pnand %p1121_p5, %p1519_p2 }
 0x16d   : > { %p1127_p8 = por %p1126_p4, %p1125_p3 }
 0x16e   : > { %p1123_p1 = pneg %p1122_p10 }
 0x16f   : > { %p1129_p11 = por %p1128_p13, %p1127_p8 }
 0x171   : > { %p1130_p12 = pnand %p1129_p11, %p1123_p1 }
 0x173   : > { %1133 = shalt.err (!%p1130_p12)
}
 0x174   : > { %s1201_s5 = smov 128   ;;  %s1202_s21 = smov 8  }
 0x175   : > { %937 = dma.vmem_to_hbm [thread:$0]  (%p1519_p2), %s1454_s19, 2048, %s1452_s7, %s666_s12, %s1201_s5, %s1201_s5, %s1202_s21  }
 0x176 PF: > { %p951_p6 = scmp.ge.s32.totalorder %s1192_s14, 2  ;;  %s696_s18 = sand.u32 1, %s1172_s9  }
 0x177   : > { %p1520_p7 = scmp.ne.s32.totalorder %s1514_s24, 0  ;;  %s697_s28 = scalar_lea.sflag [#allocation5], %s696_s18 }
 0x179   : > { %p947_p0 = pnand %p951_p6, %p1520_p7 }
 0x17b   : > { %1167 = dma.done.wait (!%p947_p0), %s697_s28, 2048  }
 0x17c   : > { %1169 = vsyncadd (!%p947_p0), %s697_s28, 4294965248  ;;  %s21_s14 = sadd.s32 1, %s1192_s14   ;;  %s1521_s9 = smov %s1176_s10 }
 0x17d   : > { %p18_p9 = scmp.ge.s32.totalorder %s21_s14, 5   ;;  %s1522_s10 = smov %s1180_s11 }
 0x17e   : > { %s1523_s11 = smov %s1274_s23  ;;  %s1524_s12 = smov %s1188_s13 }
 0x17f   : > { %s1525_s13 = smov %s1527_s17  ;;  %20 = sbr.rel (!%p18_p9) target bundleno = 8 (0x8), region = 94 }
 0x186   :  { %702 = vsyncpa [#allocation4], 1 }
 0x187   :  { %704 = vsyncpa [#allocation4 + $0x1], 1 }
 0x188   :  { %705 = vsyncpa [#allocation7], 1 }
 0x189   :  { %707 = vsyncpa [#allocation7 + $0x1], 1 }
 0x18a   :  { %708 = vsyncpa [#allocation5], 1 }
 0x18b   :  { %710 = vsyncpa [#allocation5 + $0x1], 1 }

</bundles_post_ra>
